<compile_context>
chip_gen: v6e
topology: v6e:2x2x1
jax: 0.10.0
libtpu: 0.0.40
codegen_flags: <defaults>
</compile_context>

<pallas_src>
import jax
import jax.numpy as jnp
from jax.experimental import pallas as pl
from jax.experimental.pallas import tpu as pltpu


# ---------------------------------------------------------------------------
# Fused kernel: raw NCHW in  ->  NCHW-contiguous out, 4-phase decomposition.
# ---------------------------------------------------------------------------
def _conv2x2_fused_kernel(w_ref, x_ref, o_ref):
    # w_ref: (4, Cout, Cin)        resident phase weights, w_ref[2p+q] = W[:, :, p, q]
    # x_ref: (NB, Cin, 2*THO, W)   raw NCHW input rows for this (batch, row) tile
    # o_ref: (NB, Cout, THO*Wo)    NCHW-contiguous output slab for the same tile
    nb, cin, th2, w_in = x_ref.shape
    tho = th2 // 2
    wo = w_in // 2
    for b in range(nb):                          # static unroll; nb is small
        acc = None
        for p in range(2):
            for q in range(2):
                # stride-2 phase gather: x[c, 2i+p, 2j+q] for every (i, j) in tile.
                xs = x_ref[b, :, pl.ds(p, tho, 2), pl.ds(q, wo, 2)]    # (Cin, THO, Wo)
                xs = xs.reshape(cin, tho * wo)                         # (Cin, THO*Wo)
                t = jnp.dot(w_ref[2 * p + q], xs,
                            preferred_element_type=jnp.float32)        # (Cout, THO*Wo)
                acc = t if acc is None else acc + t
        o_ref[b, :, :] = acc.astype(o_ref.dtype)


def _row_tile(ho, wo, target):
    """Output rows per grid step.  tho | Ho; block stays (8,128)-legal."""
    m = ho * wo
    if m <= target:
        return ho                                # full image: full-extent exemption
    best = None
    for cand in range(1, ho + 1):
        if ho % cand:
            continue
        if cand * wo > target:
            continue
        if (cand * wo) % 128 != 0:               # lane-dense, legal output block
            continue
        if (2 * cand) % 8 != 0:                  # input H-block sublane divisibility
            continue
        best = cand
    return best if best is not None else ho      # fallback: whole image per step


def _batch_fold(n, m, tho, ho, target):
    """Images per grid step when a single image is small.  nb | N."""
    if tho != ho:
        return 1
    best = 1
    for nb in range(1, n + 1):
        if n % nb:
            continue
        if nb * m > target:
            continue
        if nb != 1 and (n // nb) < 2:            # keep >= 2 grid steps (v7x: 2 TCs)
            continue
        best = nb
    return best


def fre_transfer(x, weight, *, target_elems=32768):
    """Fused forward pass of FreTransfer (Conv2d 4->16, k=2, s=2, no bias)."""
    N, C, H, W = x.shape
    Cout, Cin, kh, kw = weight.shape
    assert (C, kh, kw) == (Cin, 2, 2) and H % 2 == 0 and W % 2 == 0
    Ho, Wo = H // 2, W // 2
    M = Ho * Wo

    tho = _row_tile(Ho, Wo, target_elems)
    nb = _batch_fold(N, M, tho, Ho, target_elems)
    tm = tho * Wo
    grid = (N // nb, Ho // tho)

    # (kh, kw, Cout, Cin) -> (4, Cout, Cin): w_r[2p+q, o, c] == weight[o, c, p, q].
    w_r = jnp.transpose(weight, (2, 3, 0, 1)).reshape(kh * kw, Cout, Cin)

    out = pl.pallas_call(
        _conv2x2_fused_kernel,
        out_shape=jax.ShapeDtypeStruct((N, Cout, M), x.dtype),
        grid=grid,
        in_specs=[
            # 1 KiB weight: constant block index -> resident in VMEM.
            pl.BlockSpec((kh * kw, Cout, Cin), lambda bi, ri: (0, 0, 0)),
            # Streaming raw NCHW rows: nb images x (2*tho) rows x full width.
            pl.BlockSpec((nb, Cin, 2 * tho, W), lambda bi, ri: (bi, 0, ri, 0)),
        ],
        out_specs=pl.BlockSpec((nb, Cout, tm), lambda bi, ri: (bi, 0, ri)),
        compiler_params=pltpu.CompilerParams(
            dimension_semantics=("parallel", "parallel"),
            vmem_limit_bytes=32 * 1024 * 1024,
        ),
        cost_estimate=pl.CostEstimate(
            flops=2 * N * M * Cin * kh * kw * Cout,
            transcendentals=0,
            bytes_accessed=4 * (N * C * H * W + N * Cout * M + Cout * Cin * kh * kw),
        ),
    )(w_r, x)

    # (N, Cout, Ho*Wo) -> (N, Cout, Ho, Wo): contiguous reshape, no transpose.
    return out.reshape(N, Cout, Ho, Wo)


# ---------------------------------------------------------------------------
# Fallback: previously-validated im2col + matmul Pallas kernel (safety net).
# ---------------------------------------------------------------------------
def _im2col_matmul_kernel(w_ref, x_ref, o_ref):
    o_ref[...] = jnp.dot(w_ref[...], x_ref[...],
                         preferred_element_type=jnp.float32).astype(o_ref.dtype)


def fre_transfer_im2col(x, weight, *, tile_m=8192):
    N, C, H, W = x.shape
    Cout, Cin, kh, kw = weight.shape
    Ho, Wo = H // kh, W // kw
    K, M = Cin * kh * kw, Ho * Wo
    patches = (x.reshape(N, C, Ho, kh, Wo, kw)
                 .transpose(0, 1, 3, 5, 2, 4)
                 .reshape(N, K, M))
    w_mat = weight.reshape(Cout, K)
    if M <= tile_m:
        tm, m_pad = M, M
    else:
        tm = tile_m
        m_pad = pl.cdiv(M, tm) * tm
        if m_pad != M:
            patches = jnp.pad(patches, ((0, 0), (0, 0), (0, m_pad - M)))
    out = pl.pallas_call(
        _im2col_matmul_kernel,
        out_shape=jax.ShapeDtypeStruct((N, Cout, m_pad), x.dtype),
        grid=(N, m_pad // tm),
        in_specs=[pl.BlockSpec((Cout, K), lambda n, i: (0, 0)),
                  pl.BlockSpec((None, K, tm), lambda n, i: (n, 0, i))],
        out_specs=pl.BlockSpec((None, Cout, tm), lambda n, i: (n, 0, i)),
        compiler_params=pltpu.CompilerParams(
            dimension_semantics=("parallel", "parallel")),
    )(w_mat, patches)
    if m_pad != M:
        out = out[:, :, :M]
    return out.reshape(N, Cout, Ho, Wo)


if __name__ == "__main__":
    key = jax.random.PRNGKey(0)
    kx, kw_key = jax.random.split(key)

    # Small shapes consistent with the module: Conv2d(4 -> 16, k=2, s=2).
    N, Cin, H, W = 2, 4, 16, 16
    Cout, kh, kwd = 16, 2, 2

    x = jax.random.normal(kx, (N, Cin, H, W), dtype=jnp.float32)
    fan_in = Cin * kh * kwd
    bound = 1.0 / (fan_in ** 0.5)
    weight = jax.random.uniform(kw_key, (Cout, Cin, kh, kwd), dtype=jnp.float32,
                                minval=-bound, maxval=bound)

    # Reference (same semantics as the PyTorch module).
    ref = jax.lax.conv_general_dilated(
        x, weight, window_strides=(2, 2), padding="VALID",
        dimension_numbers=("NCHW", "OIHW", "NCHW"))

    def _run(fn):
        out = jax.block_until_ready(jax.jit(fn)(x, weight))
        assert out.shape == (N, Cout, H // 2, W // 2)
        assert jnp.allclose(out, ref, atol=2e-5, rtol=1e-5)
        return out

    try:
        out = _run(fre_transfer)            # fused, preferred path
    except Exception:
        out = _run(fre_transfer_im2col)     # validated Pallas fallback

    print("KERNEL_OK")
</pallas_src>

<mosaic_0001>
module attributes {stable_mosaic.version = 11 : i64} {
  func.func @_conv2x2_fused_kernel(%arg0: i32, %arg1: i32, %arg2: memref<4x16x4xf32, #tpu.memory_space<vmem>>, %arg3: memref<1x4x16x16xf32, #tpu.memory_space<vmem>>, %arg4: memref<1x16x64xf32, #tpu.memory_space<vmem>>) attributes {dimension_semantics = [#tpu.dimension_semantics<parallel>, #tpu.dimension_semantics<parallel>], iteration_bounds = array<i64: 2, 1>, scalar_prefetch = 0 : i64, scratch_operands = 0 : i64, tpu.core_type = #tpu.core_type<tc>, window_params = [{pipeline_mode = #tpu.pipeline_mode<synchronous>, transform_indices = @transform_0, window_bounds = array<i64: 4, 16, 4>}, {transform_indices = @transform_1, window_bounds = array<i64: 1, 4, 16, 16>}, {transform_indices = @transform_2, window_bounds = array<i64: 1, 16, 64>}]} {
    %c0 = arith.constant 0 : index
    %c0_0 = arith.constant 0 : index
    %c0_1 = arith.constant 0 : index
    %c0_2 = arith.constant 0 : index
    %0 = tpu.strided_load %arg3[%c0, %c0_0, %c0_1, %c0_2] {strides = array<i32: 1, 1, 2, 2>} : memref<1x4x16x16xf32, #tpu.memory_space<vmem>>, vector<1x4x8x8xf32>
    %1 = vector.shape_cast %0 : vector<1x4x8x8xf32> to vector<4x8x8xf32>
    %2 = vector.shape_cast %1 : vector<4x8x8xf32> to vector<4x64xf32>
    %c0_3 = arith.constant 0 : index
    %c0_4 = arith.constant 0 : index
    %c0_5 = arith.constant 0 : index
    %3 = vector.load %arg2[%c0_3, %c0_4, %c0_5] : memref<4x16x4xf32, #tpu.memory_space<vmem>>, vector<1x16x4xf32>
    %4 = vector.shape_cast %3 : vector<1x16x4xf32> to vector<16x4xf32>
    %cst = arith.constant dense<0.000000e+00> : vector<16x64xf32>
    %5 = tpu.matmul %4, %2, %cst {dimension_numbers = #tpu.dot_dimension_numbers<[1], [0], [0], [1], [0, 0, 1, 1], [], []>} : vector<16x4xf32>, vector<4x64xf32>, vector<16x64xf32> -> vector<16x64xf32>
    %c0_6 = arith.constant 0 : index
    %c0_7 = arith.constant 0 : index
    %c0_8 = arith.constant 0 : index
    %c1 = arith.constant 1 : index
    %6 = tpu.strided_load %arg3[%c0_6, %c0_7, %c0_8, %c1] {strides = array<i32: 1, 1, 2, 2>} : memref<1x4x16x16xf32, #tpu.memory_space<vmem>>, vector<1x4x8x8xf32>
    %7 = vector.shape_cast %6 : vector<1x4x8x8xf32> to vector<4x8x8xf32>
    %8 = vector.shape_cast %7 : vector<4x8x8xf32> to vector<4x64xf32>
    %c1_9 = arith.constant 1 : index
    %c0_10 = arith.constant 0 : index
    %c0_11 = arith.constant 0 : index
    %9 = vector.load %arg2[%c1_9, %c0_10, %c0_11] : memref<4x16x4xf32, #tpu.memory_space<vmem>>, vector<1x16x4xf32>
    %10 = vector.shape_cast %9 : vector<1x16x4xf32> to vector<16x4xf32>
    %cst_12 = arith.constant dense<0.000000e+00> : vector<16x64xf32>
    %11 = tpu.matmul %10, %8, %cst_12 {dimension_numbers = #tpu.dot_dimension_numbers<[1], [0], [0], [1], [0, 0, 1, 1], [], []>} : vector<16x4xf32>, vector<4x64xf32>, vector<16x64xf32> -> vector<16x64xf32>
    %12 = arith.addf %5, %11 : vector<16x64xf32>
    %c0_13 = arith.constant 0 : index
    %c0_14 = arith.constant 0 : index
    %c1_15 = arith.constant 1 : index
    %c0_16 = arith.constant 0 : index
    %13 = tpu.strided_load %arg3[%c0_13, %c0_14, %c1_15, %c0_16] {strides = array<i32: 1, 1, 2, 2>} : memref<1x4x16x16xf32, #tpu.memory_space<vmem>>, vector<1x4x8x8xf32>
    %14 = vector.shape_cast %13 : vector<1x4x8x8xf32> to vector<4x8x8xf32>
    %15 = vector.shape_cast %14 : vector<4x8x8xf32> to vector<4x64xf32>
    %c2 = arith.constant 2 : index
    %c0_17 = arith.constant 0 : index
    %c0_18 = arith.constant 0 : index
    %16 = vector.load %arg2[%c2, %c0_17, %c0_18] : memref<4x16x4xf32, #tpu.memory_space<vmem>>, vector<1x16x4xf32>
    %17 = vector.shape_cast %16 : vector<1x16x4xf32> to vector<16x4xf32>
    %cst_19 = arith.constant dense<0.000000e+00> : vector<16x64xf32>
    %18 = tpu.matmul %17, %15, %cst_19 {dimension_numbers = #tpu.dot_dimension_numbers<[1], [0], [0], [1], [0, 0, 1, 1], [], []>} : vector<16x4xf32>, vector<4x64xf32>, vector<16x64xf32> -> vector<16x64xf32>
    %19 = arith.addf %12, %18 : vector<16x64xf32>
    %c0_20 = arith.constant 0 : index
    %c0_21 = arith.constant 0 : index
    %c1_22 = arith.constant 1 : index
    %c1_23 = arith.constant 1 : index
    %20 = tpu.strided_load %arg3[%c0_20, %c0_21, %c1_22, %c1_23] {strides = array<i32: 1, 1, 2, 2>} : memref<1x4x16x16xf32, #tpu.memory_space<vmem>>, vector<1x4x8x8xf32>
    %21 = vector.shape_cast %20 : vector<1x4x8x8xf32> to vector<4x8x8xf32>
    %22 = vector.shape_cast %21 : vector<4x8x8xf32> to vector<4x64xf32>
    %c3 = arith.constant 3 : index
    %c0_24 = arith.constant 0 : index
    %c0_25 = arith.constant 0 : index
    %23 = vector.load %arg2[%c3, %c0_24, %c0_25] : memref<4x16x4xf32, #tpu.memory_space<vmem>>, vector<1x16x4xf32>
    %24 = vector.shape_cast %23 : vector<1x16x4xf32> to vector<16x4xf32>
    %cst_26 = arith.constant dense<0.000000e+00> : vector<16x64xf32>
    %25 = tpu.matmul %24, %22, %cst_26 {dimension_numbers = #tpu.dot_dimension_numbers<[1], [0], [0], [1], [0, 0, 1, 1], [], []>} : vector<16x4xf32>, vector<4x64xf32>, vector<16x64xf32> -> vector<16x64xf32>
    %26 = arith.addf %19, %25 : vector<16x64xf32>
    %c0_27 = arith.constant 0 : index
    %c0_28 = arith.constant 0 : index
    %c0_29 = arith.constant 0 : index
    %27 = vector.load %arg4[%c0_27, %c0_28, %c0_29] : memref<1x16x64xf32, #tpu.memory_space<vmem>>, vector<1x16x64xf32>
    %28 = vector.shape_cast %27 : vector<1x16x64xf32> to vector<16x64xf32>
    %29 = vector.shape_cast %26 : vector<16x64xf32> to vector<1x16x64xf32>
    tpu.vector_store %arg4[%c0_27, %c0_28, %c0_29], %29 {strides = array<i32>} : memref<1x16x64xf32, #tpu.memory_space<vmem>>, vector<1x16x64xf32>,
    return
  }
  func.func @transform_0(%arg0: i32, %arg1: i32) -> (i32, i32, i32) {
    %c0_i32 = arith.constant 0 : i32
    %c0_i32_0 = arith.constant 0 : i32
    %c0_i32_1 = arith.constant 0 : i32
    %c0_i32_2 = arith.constant 0 : i32
    return %c0_i32, %c0_i32_0, %c0_i32_1 : i32, i32, i32
  }
  func.func @transform_1(%arg0: i32, %arg1: i32) -> (i32, i32, i32, i32) {
    %c0_i32 = arith.constant 0 : i32
    %c0_i32_0 = arith.constant 0 : i32
    %c0_i32_1 = arith.constant 0 : i32
    return %arg0, %c0_i32, %arg1, %c0_i32_0 : i32, i32, i32, i32
  }
  func.func @transform_2(%arg0: i32, %arg1: i32) -> (i32, i32, i32) {
    %c0_i32 = arith.constant 0 : i32
    %c0_i32_0 = arith.constant 0 : i32
    return %arg0, %c0_i32, %arg1 : i32, i32, i32
  }
}

module attributes {stable_mosaic.version = 11 : i64} {
  func.func @_im2col_matmul_kernel(%arg0: i32, %arg1: i32, %arg2: memref<16x16xf32, #tpu.memory_space<vmem>>, %arg3: memref<1x16x64xf32, #tpu.memory_space<vmem>>, %arg4: memref<1x16x64xf32, #tpu.memory_space<vmem>>) attributes {dimension_semantics = [#tpu.dimension_semantics<parallel>, #tpu.dimension_semantics<parallel>], iteration_bounds = array<i64: 2, 1>, scalar_prefetch = 0 : i64, scratch_operands = 0 : i64, tpu.core_type = #tpu.core_type<tc>, window_params = [{pipeline_mode = #tpu.pipeline_mode<synchronous>, transform_indices = @transform_0, window_bounds = array<i64: 16, 16>}, {transform_indices = @transform_1, window_bounds = array<i64: 1, 16, 64>}, {transform_indices = @transform_2, window_bounds = array<i64: 1, 16, 64>}]} {
    %c0 = arith.constant 0 : index
    %c0_0 = arith.constant 0 : index
    %0 = vector.load %arg2[%c0, %c0_0] : memref<16x16xf32, #tpu.memory_space<vmem>>, vector<16x16xf32>
    %c0_1 = arith.constant 0 : index
    %c0_2 = arith.constant 0 : index
    %c0_3 = arith.constant 0 : index
    %1 = vector.load %arg3[%c0_1, %c0_2, %c0_3] : memref<1x16x64xf32, #tpu.memory_space<vmem>>, vector<1x16x64xf32>
    %2 = vector.shape_cast %1 : vector<1x16x64xf32> to vector<16x64xf32>
    %cst = arith.constant dense<0.000000e+00> : vector<16x64xf32>
    %3 = tpu.matmul %0, %2, %cst {dimension_numbers = #tpu.dot_dimension_numbers<[1], [0], [0], [1], [0, 0, 1, 1], [], []>} : vector<16x16xf32>, vector<16x64xf32>, vector<16x64xf32> -> vector<16x64xf32>
    %c0_4 = arith.constant 0 : index
    %c0_5 = arith.constant 0 : index
    %c0_6 = arith.constant 0 : index
    %4 = vector.load %arg4[%c0_4, %c0_5, %c0_6] : memref<1x16x64xf32, #tpu.memory_space<vmem>>, vector<1x16x64xf32>
    %5 = vector.shape_cast %4 : vector<1x16x64xf32> to vector<16x64xf32>
    %6 = vector.shape_cast %3 : vector<16x64xf32> to vector<1x16x64xf32>
    tpu.vector_store %arg4[%c0_4, %c0_5, %c0_6], %6 {strides = array<i32>} : memref<1x16x64xf32, #tpu.memory_space<vmem>>, vector<1x16x64xf32>,
    return
  }
  func.func @transform_0(%arg0: i32, %arg1: i32) -> (i32, i32) {
    %c0_i32 = arith.constant 0 : i32
    %c0_i32_0 = arith.constant 0 : i32
    %c0_i32_1 = arith.constant 0 : i32
    return %c0_i32, %c0_i32_0 : i32, i32
  }
  func.func @transform_1(%arg0: i32, %arg1: i32) -> (i32, i32, i32) {
    %c0_i32 = arith.constant 0 : i32
    %c0_i32_0 = arith.constant 0 : i32
    return %arg0, %c0_i32, %arg1 : i32, i32, i32
  }
  func.func @transform_2(%arg0: i32, %arg1: i32) -> (i32, i32, i32) {
    %c0_i32 = arith.constant 0 : i32
    %c0_i32_0 = arith.constant 0 : i32
    return %arg0, %c0_i32, %arg1 : i32, i32, i32
  }
}

</mosaic_0001>

<bundles_post_ra>
// kernel: fre_transfer_im2col.1
= control target key start
LH: loop header
LB: loop body
LE: loop exit
PB: predicated region body
PF: predicated region fallthrough
CT: control target
= control target key end

     0   :  { %s436_s9 = smov 0   ;;  %s438_s10 = smov 0   ;;  %s472_s0 = inlined_call_operand.vmem [shape: f32[16,16], index: 0, kind: input, shape index: {}]   ;;  %s473_s1 = inlined_call_operand.vmem [shape: f32[2,16,64], index: 1, kind: input, shape index: {}]   ;;  %s474_s2 = inlined_call_operand.vmem [shape: f32[2,16,64], index: 2, kind: output, shape index: {}]  }
   0x1   :  { %s440_s11 = smov 0  }
   0x2 LB: > { %s24_s12 = sadd.s32 1, %s415_s10  ;;  %p351_p0 = scmp.ge.s32.totalorder %s419_s11, 1  ;;  %s419_s11 = sphi %s440_s11, %s12_s11   ;;  %s415_s10 = sphi %s438_s10, %s476_s10   ;;  %s411_s9 = sphi %s436_s9, %s475_s9  }
   0x3   : > { %p26_p1 = scmp.ge.s32.totalorder %s24_s12, 2  ;;  %p131_p2 = scmp.lt.s32.totalorder %s419_s11, 3 }
   0x5   : > { %s478_s12 = smov (%p26_p1, %s24_s12), 0  ;;  %p132_p3 = pnand %p351_p0, %p131_p2 }
   0x6   : > { %p159_p4 = scmp.lt.s32.totalorder (!%p132_p3), %s411_s9, 1 }
   0x7   : > { %135 = sbr.rel (%p132_p3) target bundleno = 216 (0xd8), region = 28 }
   0xc   : > { %v175_v0 = vld [vmem:[%s472_s0] sm:$0xff]  ;;  %vm179_vm0 = vcmask 130048   ;;  %s480_s9 = smov (!%p159_p4, %s411_s9), 1  ;;  %v176_v3 = vld [vmem:[%s472_s0 + $0x8] sm:$0xff]  ;;  %vm261_vm1 = vcmask 523264  }
   0xd   : > { %370 = vmatprep.mubr.msk.f32.mxu0 %vm179_vm0, %v175_v0  ;;  %s360_s15 = sshll.u32 %s480_s9, 4 }
   0xe   : > { %s166_s18 = scalar_lea.vmem %s473_s1, %s360_s15  ;;  %s174_s23 = scalar_lea.vmem %s474_s2, %s360_s15 }
   0xf   : > { %v178_v1 = vld [vmem:[%s166_s18 + $0x8] sm:$0xff]  ;;  %v177_v2 = vld [vmem:[%s166_s18] sm:$0xff] }
  0x10   : > { %366 = vmatprep.subr.mxu0 %v178_v1 }
  0x11   : > { %367 = vmatpush3.msra.mxu0 %v178_v1 }
  0x12   : > { %368 = vmatprep.subr.mxu0 %v177_v2 }
  0x13   : > { %369 = vmatpush3.msra.mxu0 %v177_v2 }
  0x14   : > { %371 = vmatmul.mubr.msk.f32.vlgmr.msra.gmra.mxu0 %vm179_vm0, %v176_v3 }
  0xd4   : > { %v372_v4 = vpop.f32.mrf.mxu0 }
  0xd5   : > { %263 = vst.msk [vmem:[%s174_s23 + $0x8] sm:$0xff] %vm261_vm1, %v372_v4 }
  0xd6   : > { %v252_v5 = vpop.f32.mrf.mxu0 }
  0xd7   : > { %262 = vst.msk [vmem:[%s174_s23] sm:$0xff] %vm261_vm1, %v252_v5 }
  0xd8 PF: > { %s12_s11 = sadd.s32 1, %s419_s11   ;;  %s475_s9 = smov %s415_s10 }
  0xd9   : > { %p9_p5 = scmp.ge.s32.totalorder %s12_s11, 4   ;;  %s476_s10 = smov %s478_s12 }
  0xdb   :  { %11 = sbr.rel (!%p9_p5) target bundleno = 2 (0x2), region = 58 }

</bundles_post_ra>
